<compile_context>
chip_gen: v6e
topology: v6e:2x2x1
jax: 0.10.0
libtpu: 0.0.40
codegen_flags: <defaults>
</compile_context>

<pallas_src>
import jax
import jax.numpy as jnp
from jax import lax
from jax.experimental import pallas as pl
from jax.experimental.pallas import tpu as pltpu


def _cola_gcn_kernel(feat_ref, adj_ref, w_ref, b_ref, a_ref, out_ref):
    # feat_ref : [S, TB, Fin]   bf16  node s of every subgraph in this tile -> feat_ref[s]
    # adj_ref  : [TB, S*S]      f32   adj_ref[b, t*S + s] = edge weight src=s -> dst=t
    # w_ref    : [Fin, Fout]    bf16
    # b_ref    : [1, Fout]      f32
    # a_ref    : [1, 1]         f32 (SMEM)  PReLU slope
    # out_ref  : [TB, 2*Fout]   [pool_emb | anchor_out]   (lane-dense 128-wide slab)
    S, TB, fin = feat_ref.shape
    fout = w_ref.shape[1]
    alpha = a_ref[0, 0]

    # Hoisted, single bias broadcast (JAX does not CSE broadcast_in_dim).
    bias = jnp.broadcast_to(b_ref[...], (TB, fout))

    def prelu(v):
        return jnp.where(v >= 0.0, v, alpha * v)

    def l2normalize(v):
        # F.normalize(p=2, dim=1): x / max(||x||, 1e-12)  (clamp applied on the squared norm)
        ss = jnp.sum(v * v, axis=-1, keepdims=True)
        return v * lax.rsqrt(jnp.maximum(ss, 1e-24))

    # ---- One MXU call over all S*TB rows (leading-dim merge is a free relayout). ----
    xw = jnp.dot(feat_ref[...].reshape(S * TB, fin), w_ref[...],
                 preferred_element_type=jnp.float32)              # [S*TB, Fout] f32 acc

    # ---- Anchor branch: PReLU(anchor_feat @ W + b) on the *raw* anchor features (node 0).
    anchor_out = prelu(xw[0:TB] + bias)                           # [TB, Fout]

    # ---- GCN branch.  Anchor features are zeroed before the conv, so source node 0
    # contributes nothing: skip s = 0.  t-outer / s-inner, one live accumulator,
    # initialised from its first (s = 1) term.  Lane-broadcast FMAs on the VPU.
    pooled = None
    for t in range(S):
        h_t = adj_ref[:, t * S + 1: t * S + 2] * xw[TB:2 * TB]
        for s in range(2, S):
            h_t = h_t + adj_ref[:, t * S + s: t * S + s + 1] * xw[s * TB:(s + 1) * TB]
        h_t = prelu(h_t + bias)
        pooled = h_t if pooled is None else pooled + h_t
    pooled = pooled * (1.0 / S)                                   # mean over the S nodes

    # ---- Single unmasked 128-lane writeback: [pool_emb | anchor_out]. ----
    out_ref[...] = jnp.concatenate(
        [l2normalize(pooled), l2normalize(anchor_out)], axis=-1).astype(out_ref.dtype)


def _choose_tile_sub(num_subgraphs):
    """HBM-bound kernel: pick blocks of up to 512 subgraphs (amortise ~0.35us/step grid
    overhead, ~85% of HBM roofline) while keeping >= 2 (even) grid steps so the "parallel"
    grid axis can shard tiles across both v7x TensorCores.  Blocks stay ~1-2 MiB in VMEM."""
    max_tb = 512
    pairs = max(1, -(-num_subgraphs // (2 * max_tb)))   # ceil(B / (2*max_tb))
    tb = -(-num_subgraphs // (2 * pairs))                # ceil(B / (2*pairs))
    return max(16, (tb + 15) // 16 * 16)                 # align to bf16 sublane packing (16)


def prepare_subgraph_features(feat_flat, num_subgraphs, subgraph_size):
    """Convert flat [N, Fin] node features (subgraph b owns rows b*S .. b*S+S-1, anchor is
    row b*S) into the kernel's [S, B, Fin] bf16 layout.
    # TODO(synk): in the full CoLA pipeline, fuse this reorder + bf16 cast into the upstream
    # per-batch RWR subgraph feature gather so the kernel is the only HBM pass over feat."""
    fin = feat_flat.shape[1]
    return jnp.transpose(
        feat_flat.reshape(num_subgraphs, subgraph_size, fin), (1, 0, 2)
    ).astype(jnp.bfloat16)


def one_layer_gcn_cola(feat_sbf, adj_flat, weight, bias, prelu_a, *,
                       tile_sub=None, out_dtype=jnp.float32):
    """CoLA OneLayerGCN forward.

    feat_sbf : [S, B, Fin]  node-major subgraph features (bf16 preferred; node 0 = anchor).
    adj_flat : [B, S*S]     adj_flat[b, dst*S + src] = edge weight of the per-subgraph block.
    weight   : [Fin, Fout]; bias: [Fout]; prelu_a: scalar PReLU slope.
    Returns (pool_emb [B, Fout], anchor_out [B, Fout]).  Set out_dtype=jnp.bfloat16 if the
    downstream discriminator tolerates bf16 (removes ~1/3 of output HBM bytes)."""
    S, B, fin = feat_sbf.shape
    fout = weight.shape[1]
    assert adj_flat.shape == (B, S * S), "adj_flat must be [B, S*S] with dst-major flattening"

    TB = _choose_tile_sub(B) if tile_sub is None else max(16, (int(tile_sub) + 15) // 16 * 16)
    grid = pl.cdiv(B, TB)
    Bp = grid * TB

    feat_sbf = feat_sbf.astype(jnp.bfloat16)     # no-op if already bf16 (preferred)
    adj_flat = adj_flat.astype(jnp.float32)
    if Bp != B:  # zero-pad the last tile; padded rows are sliced off below
        feat_sbf = jnp.pad(feat_sbf, ((0, 0), (0, Bp - B), (0, 0)))
        adj_flat = jnp.pad(adj_flat, ((0, Bp - B), (0, 0)))

    w_bf = weight.astype(jnp.bfloat16)
    bias2 = bias.reshape(1, fout).astype(jnp.float32)
    alpha2 = jnp.reshape(prelu_a, (1, 1)).astype(jnp.float32)

    out = pl.pallas_call(
        _cola_gcn_kernel,
        out_shape=jax.ShapeDtypeStruct((Bp, 2 * fout), out_dtype),
        grid=(grid,),
        in_specs=[
            pl.BlockSpec((S, TB, fin), lambda i: (0, i, 0)),     # feat tile (bf16)
            pl.BlockSpec((TB, S * S), lambda i: (i, 0)),         # flat adjacency blocks (f32)
            pl.BlockSpec((fin, fout), lambda i: (0, 0)),         # weight (bf16, resident)
            pl.BlockSpec((1, fout), lambda i: (0, 0)),           # bias (f32)
            pl.BlockSpec((1, 1), lambda i: (0, 0), memory_space=pltpu.SMEM),  # PReLU slope
        ],
        out_specs=pl.BlockSpec((TB, 2 * fout), lambda i: (i, 0)),
        compiler_params=pltpu.CompilerParams(
            dimension_semantics=("parallel",)),  # v7x: shard subgraph tiles across both TCs
    )(feat_sbf, adj_flat, w_bf, bias2, alpha2)

    return out[:B, :fout], out[:B, fout:]


def _reference(feat, adj_blocks, weight, bias, alpha, B, S):
    """Pure-JAX f32 reference (same math as the original dense formulation)."""
    fout = weight.shape[1]

    def prelu(x):
        return jnp.where(x >= 0.0, x, alpha * x)

    def l2norm(x):
        nrm = jnp.sqrt(jnp.sum(x * x, axis=-1, keepdims=True))
        return x / jnp.maximum(nrm, 1e-12)

    anchor_embs = feat[::S, :]                                   # [B, Fin]
    feat_z = feat.at[::S, :].set(0.0)
    xw = (feat_z @ weight).reshape(B, S, fout)                   # [B, S, Fout]
    h = prelu(jnp.einsum('bts,bso->bto', adj_blocks, xw) + bias)
    pool = h.mean(axis=1)
    anchor_out = prelu(anchor_embs @ weight + bias)
    return l2norm(pool), l2norm(anchor_out)


if __name__ == "__main__":
    B, S = 30, 4              # 30 subgraphs (exercises the padded last tile), subgraph_size = 4
    Fin, Fout = 128, 64
    N = B * S

    key = jax.random.PRNGKey(0)
    kf, kw, kb, ka = jax.random.split(key, 4)

    feat = jax.random.normal(kf, (N, Fin), dtype=jnp.float32)
    limit = (6.0 / (Fin + Fout)) ** 0.5                          # Xavier-uniform
    weight = jax.random.uniform(kw, (Fin, Fout), dtype=jnp.float32,
                                minval=-limit, maxval=limit)
    bias = 0.1 * jax.random.normal(kb, (Fout,), dtype=jnp.float32)
    prelu_a = jnp.asarray([0.25], dtype=jnp.float32)             # nn.PReLU default slope
    adj_blocks = jax.random.uniform(ka, (B, S, S), dtype=jnp.float32)  # A_b[dst, src] in [0,1)

    # In production the upstream RWR-subgraph feature gather writes these layouts directly;
    # here we build them once when constructing the inputs.
    feat_sbf = prepare_subgraph_features(feat, B, S)             # [S, B, Fin] bf16
    adj_flat = adj_blocks.reshape(B, S * S)                      # [B, 16] (free reshape)

    pool_emb, anchor_emb = one_layer_gcn_cola(feat_sbf, adj_flat, weight, bias, prelu_a)
    jax.block_until_ready((pool_emb, anchor_emb))

    ref_pool, ref_anchor = _reference(feat, adj_blocks, weight, bias, 0.25, B, S)
    assert pool_emb.shape == (B, Fout) and anchor_emb.shape == (B, Fout)
    # bf16 MXU inputs with f32 accumulation -> compare at bf16-level tolerance.
    assert jnp.allclose(pool_emb, ref_pool, atol=3e-2, rtol=3e-2), \
        float(jnp.max(jnp.abs(pool_emb - ref_pool)))
    assert jnp.allclose(anchor_emb, ref_anchor, atol=3e-2, rtol=3e-2), \
        float(jnp.max(jnp.abs(anchor_emb - ref_anchor)))

    print("KERNEL_OK")
</pallas_src>

<mosaic_0001>
module attributes {stable_mosaic.version = 11 : i64} {
  func.func @_cola_gcn_kernel(%arg0: i32, %arg1: memref<4x16x128xbf16, #tpu.memory_space<vmem>>, %arg2: memref<16x16xf32, #tpu.memory_space<vmem>>, %arg3: memref<128x64xbf16, #tpu.memory_space<vmem>>, %arg4: memref<1x64xf32, #tpu.memory_space<vmem>>, %arg5: memref<1x1xf32, #tpu.memory_space<smem>>, %arg6: memref<16x128xf32, #tpu.memory_space<vmem>>) attributes {dimension_semantics = [#tpu.dimension_semantics<parallel>], iteration_bounds = array<i64: 2>, scalar_prefetch = 0 : i64, scratch_operands = 0 : i64, tpu.core_type = #tpu.core_type<tc>, window_params = [{transform_indices = @transform_0, window_bounds = array<i64: 4, 16, 128>}, {transform_indices = @transform_1, window_bounds = array<i64: 16, 16>}, {pipeline_mode = #tpu.pipeline_mode<synchronous>, transform_indices = @transform_2, window_bounds = array<i64: 128, 64>}, {pipeline_mode = #tpu.pipeline_mode<synchronous>, transform_indices = @transform_3, window_bounds = array<i64: 1, 64>}, {transform_indices = @transform_4, window_bounds = array<i64: 1, 1>}, {transform_indices = @transform_5, window_bounds = array<i64: 16, 128>}]} {
    %c0 = arith.constant 0 : index
    %c0_0 = arith.constant 0 : index
    %0 = memref.load %arg5[%c0, %c0_0] : memref<1x1xf32, #tpu.memory_space<smem>>
    %c0_1 = arith.constant 0 : index
    %c0_2 = arith.constant 0 : index
    %1 = vector.load %arg4[%c0_1, %c0_2] : memref<1x64xf32, #tpu.memory_space<vmem>>, vector<1x64xf32>
    %2 = vector.shape_cast %1 : vector<1x64xf32> to vector<1x64xf32>
    %3 = vector.broadcast %2 : vector<1x64xf32> to vector<16x64xf32>
    %c0_3 = arith.constant 0 : index
    %c0_4 = arith.constant 0 : index
    %c0_5 = arith.constant 0 : index
    %4 = vector.load %arg1[%c0_3, %c0_4, %c0_5] : memref<4x16x128xbf16, #tpu.memory_space<vmem>>, vector<4x16x128xbf16>
    %5 = vector.shape_cast %4 : vector<4x16x128xbf16> to vector<64x128xbf16>
    %c0_6 = arith.constant 0 : index
    %c0_7 = arith.constant 0 : index
    %6 = vector.load %arg3[%c0_6, %c0_7] : memref<128x64xbf16, #tpu.memory_space<vmem>>, vector<128x64xbf16>
    %cst = arith.constant dense<0.000000e+00> : vector<64x64xf32>
    %7 = tpu.matmul %5, %6, %cst {dimension_numbers = #tpu.dot_dimension_numbers<[1], [0], [0], [1], [0, 0, 1, 1], [], []>} : vector<64x128xbf16>, vector<128x64xbf16>, vector<64x64xf32> -> vector<64x64xf32>
    %8 = vector.extract_strided_slice %7 {offsets = [0, 0], sizes = [16, 64], strides = [1, 1]} : vector<64x64xf32> to vector<16x64xf32>
    %9 = arith.addf %8, %3 : vector<16x64xf32>
    %cst_8 = arith.constant 0.000000e+00 : f32
    %10 = vector.broadcast %cst_8 : f32 to vector<16x64xf32>
    %11 = arith.cmpf oge, %9, %10 : vector<16x64xf32>
    %12 = vector.broadcast %0 : f32 to vector<16x64xf32>
    %13 = arith.mulf %12, %9 : vector<16x64xf32>
    %14 = arith.select %11, %9, %13 : vector<16x64xi1>, vector<16x64xf32>
    %c0_9 = arith.constant 0 : index
    %c1 = arith.constant 1 : index
    %15 = vector.load %arg2[%c0_9, %c1] : memref<16x16xf32, #tpu.memory_space<vmem>>, vector<16x1xf32>
    %16 = vector.extract_strided_slice %7 {offsets = [16, 0], sizes = [16, 64], strides = [1, 1]} : vector<64x64xf32> to vector<16x64xf32>
    %17 = vector.broadcast %15 : vector<16x1xf32> to vector<16x64xf32>
    %18 = arith.mulf %17, %16 : vector<16x64xf32>
    %c0_10 = arith.constant 0 : index
    %c2 = arith.constant 2 : index
    %19 = vector.load %arg2[%c0_10, %c2] : memref<16x16xf32, #tpu.memory_space<vmem>>, vector<16x1xf32>
    %20 = vector.extract_strided_slice %7 {offsets = [32, 0], sizes = [16, 64], strides = [1, 1]} : vector<64x64xf32> to vector<16x64xf32>
    %21 = vector.broadcast %19 : vector<16x1xf32> to vector<16x64xf32>
    %22 = arith.mulf %21, %20 : vector<16x64xf32>
    %23 = arith.addf %18, %22 : vector<16x64xf32>
    %c0_11 = arith.constant 0 : index
    %c3 = arith.constant 3 : index
    %24 = vector.load %arg2[%c0_11, %c3] : memref<16x16xf32, #tpu.memory_space<vmem>>, vector<16x1xf32>
    %25 = vector.extract_strided_slice %7 {offsets = [48, 0], sizes = [16, 64], strides = [1, 1]} : vector<64x64xf32> to vector<16x64xf32>
    %26 = vector.broadcast %24 : vector<16x1xf32> to vector<16x64xf32>
    %27 = arith.mulf %26, %25 : vector<16x64xf32>
    %28 = arith.addf %23, %27 : vector<16x64xf32>
    %29 = arith.addf %28, %3 : vector<16x64xf32>
    %cst_12 = arith.constant 0.000000e+00 : f32
    %30 = vector.broadcast %cst_12 : f32 to vector<16x64xf32>
    %31 = arith.cmpf oge, %29, %30 : vector<16x64xf32>
    %32 = vector.broadcast %0 : f32 to vector<16x64xf32>
    %33 = arith.mulf %32, %29 : vector<16x64xf32>
    %34 = arith.select %31, %29, %33 : vector<16x64xi1>, vector<16x64xf32>
    %c0_13 = arith.constant 0 : index
    %c5 = arith.constant 5 : index
    %35 = vector.load %arg2[%c0_13, %c5] : memref<16x16xf32, #tpu.memory_space<vmem>>, vector<16x1xf32>
    %36 = vector.extract_strided_slice %7 {offsets = [16, 0], sizes = [16, 64], strides = [1, 1]} : vector<64x64xf32> to vector<16x64xf32>
    %37 = vector.broadcast %35 : vector<16x1xf32> to vector<16x64xf32>
    %38 = arith.mulf %37, %36 : vector<16x64xf32>
    %c0_14 = arith.constant 0 : index
    %c6 = arith.constant 6 : index
    %39 = vector.load %arg2[%c0_14, %c6] : memref<16x16xf32, #tpu.memory_space<vmem>>, vector<16x1xf32>
    %40 = vector.extract_strided_slice %7 {offsets = [32, 0], sizes = [16, 64], strides = [1, 1]} : vector<64x64xf32> to vector<16x64xf32>
    %41 = vector.broadcast %39 : vector<16x1xf32> to vector<16x64xf32>
    %42 = arith.mulf %41, %40 : vector<16x64xf32>
    %43 = arith.addf %38, %42 : vector<16x64xf32>
    %c0_15 = arith.constant 0 : index
    %c7 = arith.constant 7 : index
    %44 = vector.load %arg2[%c0_15, %c7] : memref<16x16xf32, #tpu.memory_space<vmem>>, vector<16x1xf32>
    %45 = vector.extract_strided_slice %7 {offsets = [48, 0], sizes = [16, 64], strides = [1, 1]} : vector<64x64xf32> to vector<16x64xf32>
    %46 = vector.broadcast %44 : vector<16x1xf32> to vector<16x64xf32>
    %47 = arith.mulf %46, %45 : vector<16x64xf32>
    %48 = arith.addf %43, %47 : vector<16x64xf32>
    %49 = arith.addf %48, %3 : vector<16x64xf32>
    %cst_16 = arith.constant 0.000000e+00 : f32
    %50 = vector.broadcast %cst_16 : f32 to vector<16x64xf32>
    %51 = arith.cmpf oge, %49, %50 : vector<16x64xf32>
    %52 = vector.broadcast %0 : f32 to vector<16x64xf32>
    %53 = arith.mulf %52, %49 : vector<16x64xf32>
    %54 = arith.select %51, %49, %53 : vector<16x64xi1>, vector<16x64xf32>
    %55 = arith.addf %34, %54 : vector<16x64xf32>
    %c0_17 = arith.constant 0 : index
    %c9 = arith.constant 9 : index
    %56 = vector.load %arg2[%c0_17, %c9] : memref<16x16xf32, #tpu.memory_space<vmem>>, vector<16x1xf32>
    %57 = vector.extract_strided_slice %7 {offsets = [16, 0], sizes = [16, 64], strides = [1, 1]} : vector<64x64xf32> to vector<16x64xf32>
    %58 = vector.broadcast %56 : vector<16x1xf32> to vector<16x64xf32>
    %59 = arith.mulf %58, %57 : vector<16x64xf32>
    %c0_18 = arith.constant 0 : index
    %c10 = arith.constant 10 : index
    %60 = vector.load %arg2[%c0_18, %c10] : memref<16x16xf32, #tpu.memory_space<vmem>>, vector<16x1xf32>
    %61 = vector.extract_strided_slice %7 {offsets = [32, 0], sizes = [16, 64], strides = [1, 1]} : vector<64x64xf32> to vector<16x64xf32>
    %62 = vector.broadcast %60 : vector<16x1xf32> to vector<16x64xf32>
    %63 = arith.mulf %62, %61 : vector<16x64xf32>
    %64 = arith.addf %59, %63 : vector<16x64xf32>
    %c0_19 = arith.constant 0 : index
    %c11 = arith.constant 11 : index
    %65 = vector.load %arg2[%c0_19, %c11] : memref<16x16xf32, #tpu.memory_space<vmem>>, vector<16x1xf32>
    %66 = vector.extract_strided_slice %7 {offsets = [48, 0], sizes = [16, 64], strides = [1, 1]} : vector<64x64xf32> to vector<16x64xf32>
    %67 = vector.broadcast %65 : vector<16x1xf32> to vector<16x64xf32>
    %68 = arith.mulf %67, %66 : vector<16x64xf32>
    %69 = arith.addf %64, %68 : vector<16x64xf32>
    %70 = arith.addf %69, %3 : vector<16x64xf32>
    %cst_20 = arith.constant 0.000000e+00 : f32
    %71 = vector.broadcast %cst_20 : f32 to vector<16x64xf32>
    %72 = arith.cmpf oge, %70, %71 : vector<16x64xf32>
    %73 = vector.broadcast %0 : f32 to vector<16x64xf32>
    %74 = arith.mulf %73, %70 : vector<16x64xf32>
    %75 = arith.select %72, %70, %74 : vector<16x64xi1>, vector<16x64xf32>
    %76 = arith.addf %55, %75 : vector<16x64xf32>
    %c0_21 = arith.constant 0 : index
    %c13 = arith.constant 13 : index
    %77 = vector.load %arg2[%c0_21, %c13] : memref<16x16xf32, #tpu.memory_space<vmem>>, vector<16x1xf32>
    %78 = vector.extract_strided_slice %7 {offsets = [16, 0], sizes = [16, 64], strides = [1, 1]} : vector<64x64xf32> to vector<16x64xf32>
    %79 = vector.broadcast %77 : vector<16x1xf32> to vector<16x64xf32>
    %80 = arith.mulf %79, %78 : vector<16x64xf32>
    %c0_22 = arith.constant 0 : index
    %c14 = arith.constant 14 : index
    %81 = vector.load %arg2[%c0_22, %c14] : memref<16x16xf32, #tpu.memory_space<vmem>>, vector<16x1xf32>
    %82 = vector.extract_strided_slice %7 {offsets = [32, 0], sizes = [16, 64], strides = [1, 1]} : vector<64x64xf32> to vector<16x64xf32>
    %83 = vector.broadcast %81 : vector<16x1xf32> to vector<16x64xf32>
    %84 = arith.mulf %83, %82 : vector<16x64xf32>
    %85 = arith.addf %80, %84 : vector<16x64xf32>
    %c0_23 = arith.constant 0 : index
    %c15 = arith.constant 15 : index
    %86 = vector.load %arg2[%c0_23, %c15] : memref<16x16xf32, #tpu.memory_space<vmem>>, vector<16x1xf32>
    %87 = vector.extract_strided_slice %7 {offsets = [48, 0], sizes = [16, 64], strides = [1, 1]} : vector<64x64xf32> to vector<16x64xf32>
    %88 = vector.broadcast %86 : vector<16x1xf32> to vector<16x64xf32>
    %89 = arith.mulf %88, %87 : vector<16x64xf32>
    %90 = arith.addf %85, %89 : vector<16x64xf32>
    %91 = arith.addf %90, %3 : vector<16x64xf32>
    %cst_24 = arith.constant 0.000000e+00 : f32
    %92 = vector.broadcast %cst_24 : f32 to vector<16x64xf32>
    %93 = arith.cmpf oge, %91, %92 : vector<16x64xf32>
    %94 = vector.broadcast %0 : f32 to vector<16x64xf32>
    %95 = arith.mulf %94, %91 : vector<16x64xf32>
    %96 = arith.select %93, %91, %95 : vector<16x64xi1>, vector<16x64xf32>
    %97 = arith.addf %76, %96 : vector<16x64xf32>
    %cst_25 = arith.constant 2.500000e-01 : f32
    %98 = vector.broadcast %cst_25 : f32 to vector<16x64xf32>
    %99 = arith.mulf %97, %98 : vector<16x64xf32>
    %100 = arith.mulf %99, %99 : vector<16x64xf32>
    %cst_26 = arith.constant dense<0.000000e+00> : vector<16xf32>
    %101 = vector.multi_reduction <add>, %100, %cst_26 [1] : vector<16x64xf32> to vector<16xf32>
    %102 = vector.shape_cast %101 : vector<16xf32> to vector<16x1xf32>
    %cst_27 = arith.constant 1.000000e-24 : f32
    %103 = vector.broadcast %cst_27 : f32 to vector<16x1xf32>
    %104 = arith.maximumf %102, %103 : vector<16x1xf32>
    %105 = math.rsqrt %104 : vector<16x1xf32>
    %106 = vector.broadcast %105 : vector<16x1xf32> to vector<16x64xf32>
    %107 = arith.mulf %99, %106 : vector<16x64xf32>
    %108 = arith.mulf %14, %14 : vector<16x64xf32>
    %cst_28 = arith.constant dense<0.000000e+00> : vector<16xf32>
    %109 = vector.multi_reduction <add>, %108, %cst_28 [1] : vector<16x64xf32> to vector<16xf32>
    %110 = vector.shape_cast %109 : vector<16xf32> to vector<16x1xf32>
    %cst_29 = arith.constant 1.000000e-24 : f32
    %111 = vector.broadcast %cst_29 : f32 to vector<16x1xf32>
    %112 = arith.maximumf %110, %111 : vector<16x1xf32>
    %113 = math.rsqrt %112 : vector<16x1xf32>
    %114 = vector.broadcast %113 : vector<16x1xf32> to vector<16x64xf32>
    %115 = arith.mulf %14, %114 : vector<16x64xf32>
    %116 = tpu.concatenate %107, %115 in 1 : vector<16x64xf32>, vector<16x64xf32> -> vector<16x128xf32>
    %c0_30 = arith.constant 0 : index
    %c0_31 = arith.constant 0 : index
    %117 = vector.load %arg6[%c0_30, %c0_31] : memref<16x128xf32, #tpu.memory_space<vmem>>, vector<16x128xf32>
    tpu.vector_store %arg6[%c0_30, %c0_31], %116 {strides = array<i32>} : memref<16x128xf32, #tpu.memory_space<vmem>>, vector<16x128xf32>,
    return
  }
  func.func @transform_0(%arg0: i32) -> (i32, i32, i32) {
    %c0_i32 = arith.constant 0 : i32
    %c0_i32_0 = arith.constant 0 : i32
    %c0_i32_1 = arith.constant 0 : i32
    return %c0_i32, %arg0, %c0_i32_0 : i32, i32, i32
  }
  func.func @transform_1(%arg0: i32) -> (i32, i32) {
    %c0_i32 = arith.constant 0 : i32
    %c0_i32_0 = arith.constant 0 : i32
    return %arg0, %c0_i32 : i32, i32
  }
  func.func @transform_2(%arg0: i32) -> (i32, i32) {
    %c0_i32 = arith.constant 0 : i32
    %c0_i32_0 = arith.constant 0 : i32
    %c0_i32_1 = arith.constant 0 : i32
    return %c0_i32, %c0_i32_0 : i32, i32
  }
  func.func @transform_3(%arg0: i32) -> (i32, i32) {
    %c0_i32 = arith.constant 0 : i32
    %c0_i32_0 = arith.constant 0 : i32
    %c0_i32_1 = arith.constant 0 : i32
    return %c0_i32, %c0_i32_0 : i32, i32
  }
  func.func @transform_4(%arg0: i32) -> (i32, i32) {
    %c0_i32 = arith.constant 0 : i32
    %c0_i32_0 = arith.constant 0 : i32
    %c0_i32_1 = arith.constant 0 : i32
    return %c0_i32, %c0_i32_0 : i32, i32
  }
  func.func @transform_5(%arg0: i32) -> (i32, i32) {
    %c0_i32 = arith.constant 0 : i32
    %c0_i32_0 = arith.constant 0 : i32
    return %arg0, %c0_i32 : i32, i32
  }
}

</mosaic_0001>

<bundles_post_ra>
// kernel: tpu_custom_call.1
= control target key start
LH: loop header
LB: loop body
LE: loop exit
PB: predicated region body
PF: predicated region fallthrough
CT: control target
= control target key end

     0   :  { %s1311_s0 = inlined_call_operand.vmem [shape: bf16[4,32,128], index: 0, kind: input, shape index: {}]   ;;  %s1312_s1 = inlined_call_operand.vmem [shape: f32[32,16], index: 1, kind: input, shape index: {}]   ;;  %s1313_s2 = inlined_call_operand.vmem [shape: bf16[128,64], index: 2, kind: input, shape index: {}]   ;;  %s1314_s3 = inlined_call_operand.vmem [shape: f32[1,64], index: 3, kind: input, shape index: {}]   ;;  %s1315_s4 = inlined_call_operand.<no memory space> [shape: f32[1,1], index: 4, kind: input, shape index: {}]   ;;  %s1316_s5 = inlined_call_operand.hbm [shape: f32[32,128], index: 5, kind: output, shape index: {}]  }
   0x1   :  { %10 = sst [smem:[#allocation2]] %s1315_s4 }
   0x2   :  { %11 = vsyncpa [#allocation5], 0 }
   0x3   :  { %13 = vsyncpa [#allocation5 + $0x1], 0  ;;  %s1101_s20 = smov 0   ;;  %s1103_s21 = smov 0  }
   0x4   :  { %s1105_s22 = smov 0   ;;  %s1107_s23 = smov 0  }
   0x5 LB: > { %s1122_s4 = sadd.s32 4294967295, %s1050_s23   ;;  %s814_s24 = sadd.s32 4294967294, %s1050_s23   ;;  %s1050_s23 = sphi %s1107_s23, %s1322_s23   ;;  %s1046_s22 = sphi %s1105_s22, %s1321_s22   ;;  %s1042_s21 = sphi %s1103_s21, %s1320_s21   ;;  %s1038_s20 = sphi %s1101_s20, %s1319_s20  }
   0x6   : > { %s1126_s25 = sadd.s32 1, %s1050_s23   ;;  %s26_s26 = sadd.s32 1, %s1046_s22 }
   0x7   : > { %s23_s27 = ssub.s32 %s1050_s23, %s1126_s25  ;;  %p33_p0 = scmp.ne.s32.totalorder %s1046_s22, %s1042_s21 }
   0x8   : > { %p24_p1 = scmp.eq.s32.totalorder %s23_s27, 0  ;;  %p34_p2 = scmp.eq.s32.totalorder %s1050_s23, 0 }
   0x9   : > { %p152_p3 = scmp.eq.s32.totalorder %s1122_s4, 1  ;;  %p157_p4 = scmp.ne.s32.totalorder %s1042_s21, %s1038_s20 }
   0xa   : > { %s1138_s28 = scalar_select %p24_p1, %s1046_s22, %s26_s26  }
   0xb   : > { %p35_p5 = por %p34_p2, %p33_p0  ;;  %p1140_p6 = por %p152_p3, %p33_p0 }
   0xc   : > { %p158_p7 = scmp.eq.s32.totalorder %s814_s24, 1  ;;  %p816_p9 = scmp.ge.s32.totalorder %s1050_s23, 2 }
   0xe   : > { %p1144_p8 = por %p158_p7, %p157_p4  ;;  %183 = sbr.rel (%p816_p9) target bundleno = 25 (0x19), region = 28 }
  0x13   : > { %186 = sbr.rel (!%p35_p5) target bundleno = 25 (0x19), region = 32  ;;  %s188_s6 = sand.u32 (%p35_p5), 1, %s1046_s22  }
  0x14   : > { %s843_s7 = sshll.u32 (%p35_p5), %s1050_s23, 3  ;;  %s817_s8 = sshll.u32 (%p35_p5), %s188_s6, 5 }
  0x15   : > { %s193_s11 = scalar_lea.vmem (%p35_p5), %s1311_s0, %s843_s7  ;;  %s190_s12 = scalar_lea.vmem (%p35_p5), [#allocation3], %s817_s8 }
  0x16   : > { %v210_v0 = vld [vmem:[%s193_s11] sm:$0xff] (%p35_p5)   ;;  %v214_v1 = vld [vmem:[%s193_s11 + $0x10] sm:$0xff] (%p35_p5)  }
  0x17   : > { %v218_v2 = vld [vmem:[%s193_s11 + $0x20] sm:$0xff] (%p35_p5)   ;;  %211 = vst [vmem:[%s190_s12] sm:$0xff] (%p35_p5), %v210_v0   ;;  %215 = vst [vmem:[%s190_s12 + $0x8] sm:$0xff] (%p35_p5), %v214_v1   ;;  %v222_v3 = vld [vmem:[%s193_s11 + $0x30] sm:$0xff] (%p35_p5)  }
  0x18   : > { %219 = vst [vmem:[%s190_s12 + $0x10] sm:$0xff] %v218_v2   ;;  %223 = vst [vmem:[%s190_s12 + $0x18] sm:$0xff] %v222_v3  }
  0x19 PF: > { %p820_p10 = scmp.ge.s32.totalorder %s1050_s23, 1  ;;  %p273_p11 = scmp.lt.s32.totalorder %s1050_s23, 3 }
  0x1b   : > { %p274_p12 = pnand %p820_p10, %p273_p11 }
  0x1c   : > { %s1162_s15 = sand.u32 (!%p274_p12), 1, %s1042_s21   ;;  %s823_s26 = sshll.u32 (!%p274_p12), %s1122_s4, 1 }
  0x1d   : > { %277 = sbr.rel (%p274_p12) target bundleno = 563 (0x233), region = 77  ;;  %s821_s18 = sshll.u32 (!%p274_p12), %s1162_s15, 5 }
  0x1e   : > { %p314_p13 = scmp.lt.s32.totalorder (!%p274_p12), %s823_s26, 3  ;;  %s1175_s7 = scalar_lea.vmem (!%p274_p12), [#allocation3], %s821_s18 }
  0x1f   : > { %s1065_s17 = smov (!%p274_p12), [#allocation4]  }
  0x20   : > { %s994_s18 = sshll.u32 (!%p274_p12), %s1065_s17, 4  ;;  %s995_s18 = int_to_ptr.vmem [resolvable:$false] %s994_s18 }
  0x21   : > { %s996_s19 = scalar_lea.vmem (!%p274_p12), %s995_s18, 512 }
  0x22   : > { %v970_v4 = vld [vmem:[%s1313_s2 + $0x38] sm:$0xff]   ;;  %v971_v5 = vld [vmem:[%s1313_s2 + $0x30] sm:$0xff]   ;;  %v972_v6 = vld [vmem:[%s1313_s2 + $0x28] sm:$0xff]   ;;  %v1052_v7 = vmov 2   ;;  %s1324_s26 = smov (!%p314_p13, %s823_s26), 3  ;;  %v1053_v14 = vmov 1  }
  0x23   : > { %857 = vmatprep.subr.bf16.mxu0 %v970_v4  ;;  %881 = vmatprep.subr.bf16.mxu1 %v970_v4  ;;  %v973_v8 = vld [vmem:[%s1313_s2 + $0x20] sm:$0xff]   ;;  %v979_v10 = vld [vmem:[%s1175_s7 + $0x10] sm:$0xff]   ;;  %s824_s8 = sshll.u32 %s1324_s26, 3  ;;  %v974_v11 = vld [vmem:[%s1313_s2 + $0x18] sm:$0xff]   ;;  %v1054_v17 = vmov 5   ;;  %v1055_v19 = vmov 6  }
  0x24   : > { %858 = vmatpush3.bf16.msra.mxu0 %v970_v4  ;;  %889 = vmatpush3.bf16.msra.mxu1 %v970_v4  ;;  %v978_v9 = vld [vmem:[%s1175_s7] sm:$0xff]   ;;  %s317_s11 = scalar_lea.vmem %s1312_s1, %s824_s8  ;;  %v975_v15 = vld [vmem:[%s1313_s2 + $0x10] sm:$0xff]   ;;  %v976_v16 = vld [vmem:[%s1313_s2 + $0x8] sm:$0xff]   ;;  %v1056_v22 = vmov 3   ;;  %v1057_v23 = vmov 7   ;;  %v1058_v24 = vmov 9  }
  0x25   : > { %859 = vmatprep.subr.bf16.mxu0 %v971_v5  ;;  %882 = vmatprep.subr.bf16.mxu1 %v971_v5  ;;  %v1185_v12 = vld [vmem:[%s317_s11] sm:$0xff]  ;;  %v1188_v13 = vld [vmem:[%s317_s11 + $0x8] sm:$0xff]  ;;  %v981_v21 = vld [vmem:[%s1175_s7 + $0x18] sm:$0xff]   ;;  %v1059_v25 = vmov 11   ;;  %v1060_v26 = vmov 13   ;;  %v1061_v27 = vmov 10  }
  0x26   : > { %952 = vset.pattern.permute.xlu1 %v1052_v7  ;;  %873 = vmatprep.mubr.bf16.mxu0 %v978_v9  ;;  %v977_v18 = vld [vmem:[%s1313_s2] sm:$0xff]   ;;  %v980_v20 = vld [vmem:[%s1175_s7 + $0x8] sm:$0xff]   ;;  %v1062_v28 = vmov 15   ;;  %v1063_v29 = vmov 14   ;;  %s321_s26 = sld [smem:[#allocation2]]  ;;  %vm681_vm1 = vcmask 523264  }
  0x27   : > { %877 = vmatprep.mubr.bf16.mxu1 %v979_v10  ;;  %514 = vperm.xlu1 %952, %v1185_v12   ;;  %v1229_v53 = vld [vmem:[%s1314_s3] ss:$0 sm:$0xff]  ;;  %s1064_s7 = smov 64   ;;  %s822_s8 = sshll.u32 %s1162_s15, 4 }
  0x28   : > { %860 = vmatpush3.bf16.msra.mxu0 %v971_v5  ;;  %890 = vmatpush3.bf16.msra.mxu1 %v971_v5  ;;  %s311_s9 = scalar_lea.vmem [#allocation4], %s822_s8  ;;  %s844_s11 = sshll.u32 %s1122_s4, 8 }
  0x29   : > { %861 = vmatprep.subr.bf16.mxu0 %v972_v6  ;;  %883 = vmatprep.subr.bf16.mxu1 %v972_v6  ;;  %s734_s10 = sshll.u32 %s311_s9, 4  ;;  %s1266_s14 = scalar_lea.hbm %s1316_s5, %s844_s11  ;;  %s1261_s10 = int_to_ptr.vmem [resolvable:$true] %s734_s10 }
  0x2a   : > { %951 = vset.pattern.permute.xlu0 %v1053_v14  ;;  %s721_s4 = scalar_lea.sflag [#allocation5], %s1162_s15  ;;  %s990_s16 = scalar_lea.vmem %s1261_s10, 256 }
  0x2b   : > { %518 = vperm.xlu1 %952, %v1188_v13   ;;  %503 = vperm.xlu0 %951, %v1185_v12   ;;  %p991_p0 = scmp.ne.s32.totalorder %s1261_s10, %s990_s16  ;;  %p997_p3 = scmp.lt.s32.totalorder %s1261_s10, %s995_s18 }
  0x2c   : > { %862 = vmatpush3.bf16.msra.mxu0 %v972_v6  ;;  %891 = vmatpush3.bf16.msra.mxu1 %v972_v6  ;;  %v1231_v55 = vstv %s321_s26  ;;  %p998_p4 = scmp.lt.s32.totalorder %s996_s19, %s990_s16 }
  0x2d   : > { %863 = vmatprep.subr.bf16.mxu0 %v973_v8  ;;  %884 = vmatprep.subr.bf16.mxu1 %v973_v8  ;;  %p992_p1 = pnand %p991_p0, %p1140_p6 }
  0x2e   : > { %p999_p5 = por %p998_p4, %p997_p3 }
  0x2f   : > { %954 = vset.pattern.permute.xlu1 %v1054_v17  ;;  %508 = vperm.xlu0 %951, %v1188_v13   ;;  %p993_p2 = pneg %p992_p1 }
  0x30   : > { %864 = vmatpush3.bf16.msra.mxu0 %v973_v8  ;;  %892 = vmatpush3.bf16.msra.mxu1 %v973_v8 }
  0x31   : > { %865 = vmatprep.subr.bf16.mxu0 %v974_v11  ;;  %885 = vmatprep.subr.bf16.mxu1 %v974_v11  ;;  %p1000_p7 = pnand %p999_p5, %p993_p2 }
  0x32   : > { %550 = vperm.xlu1 %954, %v1188_v13  }
  0x33   : > { %953 = vset.pattern.permute.xlu0 %v1054_v17 }
  0x34   : > { %866 = vmatpush3.bf16.msra.mxu0 %v974_v11  ;;  %893 = vmatpush3.bf16.msra.mxu1 %v974_v11 }
  0x35   : > { %867 = vmatprep.subr.bf16.mxu0 %v975_v15  ;;  %886 = vmatprep.subr.bf16.mxu1 %v975_v15 }
  0x36   : > { %955 = vset.pattern.permute.xlu1 %v1055_v19  ;;  %546 = vperm.xlu0 %953, %v1185_v12  }
  0x37   : > { %556 = vperm.xlu1 %955, %v1185_v12  }
  0x38   : > { %868 = vmatpush3.bf16.msra.mxu0 %v975_v15  ;;  %894 = vmatpush3.bf16.msra.mxu1 %v975_v15 }
  0x39   : > { %869 = vmatprep.subr.bf16.mxu0 %v976_v16  ;;  %887 = vmatprep.subr.bf16.mxu1 %v976_v16 }
  0x3a   : > { %956 = vset.pattern.permute.xlu0 %v1055_v19 }
  0x3b   : > { %560 = vperm.xlu0 %956, %v1188_v13   ;;  %957 = vset.pattern.permute.xlu1 %v1056_v22 }
  0x3c   : > { %870 = vmatpush3.bf16.msra.mxu0 %v976_v16  ;;  %895 = vmatpush3.bf16.msra.mxu1 %v976_v16 }
  0x3d   : > { %871 = vmatprep.subr.bf16.mxu0 %v977_v18  ;;  %888 = vmatprep.subr.bf16.mxu1 %v977_v18 }
  0x3e   : > { %526 = vperm.xlu1 %957, %v1185_v12  }
  0x3f   : > { %958 = vset.pattern.permute.xlu0 %v1057_v23 }
  0x40   : > { %872 = vmatpush3.bf16.msra.mxu0 %v977_v18  ;;  %896 = vmatpush3.bf16.msra.mxu1 %v977_v18 }
  0x41   : > { %568 = vperm.xlu0 %958, %v1185_v12  }
  0x42   : > { %530 = vperm.xlu1 %957, %v1188_v13  }
  0x43   : > { %874 = vmatmul.mubr.bf16.vlgmr.msra.gmra.mxu0 %v980_v20  ;;  %878 = vmatmul.mubr.bf16.vlgmr.msra.gmra.mxu1 %v981_v21 }
  0x45   : > { %961 = vset.pattern.permute.xlu0 %v1058_v24 }
  0x46   : > { %594 = vperm.xlu0 %961, %v1188_v13   ;;  %959 = vset.pattern.permute.xlu1 %v1057_v23 }
  0x47   : > { %572 = vperm.xlu1 %959, %v1188_v13  }
  0x4a   : > { %963 = vset.pattern.permute.xlu0 %v1059_v25 }
  0x4b   : > { %612 = vperm.xlu0 %963, %v1185_v12   ;;  %960 = vset.pattern.permute.xlu1 %v1058_v24 }
  0x4c   : > { %590 = vperm.xlu1 %960, %v1185_v12  }
  0x4f   : > { %966 = vset.pattern.permute.xlu0 %v1060_v26 }
  0x50   : > { %638 = vperm.xlu0 %966, %v1188_v13   ;;  %962 = vset.pattern.permute.xlu1 %v1061_v27 }
  0x51   : > { %600 = vperm.xlu1 %962, %v1185_v12  }
  0x54   : > { %968 = vset.pattern.permute.xlu0 %v1062_v28 }
  0x55   : > { %656 = vperm.xlu0 %968, %v1185_v12   ;;  %604 = vperm.xlu1 %962, %v1188_v13  }
  0x59   : > { %964 = vset.pattern.permute.xlu1 %v1059_v25 }
  0x5a   : > { %616 = vperm.xlu1 %964, %v1188_v13  }
  0x5e   : > { %965 = vset.pattern.permute.xlu1 %v1060_v26 }
  0x5f   : > { %634 = vperm.xlu1 %965, %v1185_v12  }
  0x63   : > { %967 = vset.pattern.permute.xlu1 %v1063_v29 }
  0x64   : > { %644 = vperm.xlu1 %967, %v1185_v12  }
  0x68   : > { %648 = vperm.xlu1 %967, %v1188_v13  }
  0x6c   : > { %969 = vset.pattern.permute.xlu1 %v1062_v28 }
  0x6d   : > { %660 = vperm.xlu1 %969, %v1188_v13  }
  0xa2   : > { %v515_v30 = vpop.permute.xlu1 %514 }
  0xa6   : > { %v1224_v31 = vpop.permute.xlu1 %518  ;;  %v504_v35 = vpop.permute.xlu0 %503 }
  0xaa   : > { %v509_v37 = vpop.permute.xlu0 %508 }
  0xad   : > { %v551_v32 = vpop.permute.xlu1 %550 }
  0xb1   : > { %v547_v39 = vpop.permute.xlu0 %546 }
  0xb2   : > { %v557_v33 = vpop.permute.xlu1 %556 }
  0xb6   : > { %v561_v41 = vpop.permute.xlu0 %560 }
  0xb9   : > { %v527_v34 = vpop.permute.xlu1 %526 }
  0xbc   : > { %v569_v43 = vpop.permute.xlu0 %568 }
  0xbd   : > { %v531_v36 = vpop.permute.xlu1 %530 }
  0xc1   : > { %v595_v45 = vpop.permute.xlu0 %594 }
  0xc2   : > { %v573_v38 = vpop.permute.xlu1 %572 }
  0xc6   : > { %v613_v47 = vpop.permute.xlu0 %612 }
  0xc7   : > { %v591_v40 = vpop.permute.xlu1 %590 }
  0xcb   : > { %v639_v49 = vpop.permute.xlu0 %638 }
  0xcc   : > { %v601_v42 = vpop.permute.xlu1 %600 }
  0xd0   : > { %v605_v44 = vpop.permute.xlu1 %604  ;;  %v657_v56 = vpop.permute.xlu0 %656 }
  0xd5   : > { %v617_v46 = vpop.permute.xlu1 %616 }
  0xda   : > { %v635_v48 = vpop.permute.xlu1 %634 }
  0xdf   : > { %v645_v50 = vpop.permute.xlu1 %644 }
  0xe3   : > { %v649_v3 = vpop.permute.xlu1 %648 }
 0x103   : > { %v875_v51 = vpop.f32.mrf.mxu0  ;;  %v879_v52 = vpop.f32.mrf.mxu1 }
 0x104   : > { %v511_v54 = vmul.f32 %v875_v51, %v504_v35  ;;  %v553_v57 = vmul.f32 %v875_v51, %v547_v39  ;;  %v597_v58 = vmul.f32 %v875_v51, %v591_v40  ;;  %v533_v59 = vmul.f32 %v879_v52, %v527_v34 }
 0x105   : > { %v575_v60 = vmul.f32 %v879_v52, %v569_v43  ;;  %v459_v61 = vpop.f32.mrf.mxu0  ;;  %v475_v62 = vpop.f32.mrf.mxu1  ;;  %v641_v4 = vmul.f32 %v875_v51, %v635_v48  ;;  %v619_v5 = vmul.f32 %v879_v52, %v613_v47  ;;  %v663_v7 = vmul.f32 %v879_v52, %v657_v56 }
 0x106   : > { %v490_v63 = vadd.f32 %v1229_v53, %v459_v61  ;;  %v521_v0 = vmul.f32 %v515_v30, %v475_v62  ;;  %v563_v1 = vmul.f32 %v557_v33, %v475_v62  ;;  %v607_v2 = vmul.f32 %v601_v42, %v475_v62  ;;  %v661_v30 = vpop.permute.xlu1 %660 }
 0x107   : > { %v651_v6 = vmul.f32 %v645_v50, %v475_v62  ;;  %v876_v8 = vpop.f32.mrf.mxu0  ;;  %v880_v9 = vpop.f32.mrf.mxu1 }
 0x108   : > { %vm492_vm0 = vcmp.ge.f32.partialorder %v490_v63, 0.0  ;;  %v523_v10 = vadd.f32 %v521_v0, %v511_v54  ;;  %v565_v11 = vadd.f32 %v563_v1, %v553_v57  ;;  %v495_v12 = vmul.f32 %v1231_v55, %v490_v63 }
 0x109   : > { %v609_v13 = vadd.f32 %v607_v2, %v597_v58  ;;  %v653_v14 = vadd.f32 %v651_v6, %v641_v4  ;;  %v512_v15 = vmul.f32 %v876_v8, %v509_v37  ;;  %v462_v16 = vpop.f32.mrf.mxu0  ;;  %v554_v19 = vmul.f32 %v876_v8, %v551_v32  ;;  %v478_v21 = vpop.f32.mrf.mxu1 }
 0x10a   : > { %v535_v17 = vadd.f32 %v533_v59, %v523_v10  ;;  %v577_v18 = vadd.f32 %v575_v60, %v565_v11  ;;  %v598_v20 = vmul.f32 %v876_v8, %v595_v45  ;;  %v642_v24 = vmul.f32 %v876_v8, %v639_v49 }
 0x10b   : > { %v621_v22 = vadd.f32 %v619_v5, %v609_v13  ;;  %v665_v23 = vadd.f32 %v663_v7, %v653_v14  ;;  %v534_v25 = vmul.f32 %v880_v9, %v531_v36  ;;  %v576_v28 = vmul.f32 %v880_v9, %v573_v38 }
 0x10c   : > { %v537_v26 = vadd.f32 %v1229_v53, %v535_v17  ;;  %v579_v27 = vadd.f32 %v1229_v53, %v577_v18  ;;  %v491_v29 = vadd.f32 %v1229_v53, %v462_v16  ;;  %v620_v34 = vmul.f32 %v880_v9, %v617_v46 }
 0x10d   : > { %v623_v33 = vadd.f32 %v1229_v53, %v621_v22  ;;  %v522_v35 = vmul.f32 %v1224_v31, %v478_v21  ;;  %v564_v32 = vmul.f32 %v561_v41, %v478_v21  ;;  %v608_v39 = vmul.f32 %v605_v44, %v478_v21 }
 0x10e   : > { %vm493_vm2 = vcmp.ge.f32.partialorder %v491_v29, 0.0  ;;  %v496_v37 = vmul.f32 %v1231_v55, %v491_v29  ;;  %v652_v40 = vmul.f32 %v649_v3, %v478_v21  ;;  %v667_v36 = vadd.f32 %v1229_v53, %v665_v23 }
 0x10f   : > { %v524_v42 = vadd.f32 %v522_v35, %v512_v15  ;;  %v566_v43 = vadd.f32 %v564_v32, %v554_v19  ;;  %v664_v45 = vmul.f32 %v880_v9, %v661_v30  ;;  %v610_v38 = vadd.f32 %v608_v39, %v598_v20 }
 0x110   : > { %v654_v47 = vadd.f32 %v652_v40, %v642_v24  ;;  %v497_v48 = vsel %vm492_vm0, %v490_v63, %v495_v12  ;;  %v498_v49 = vsel %vm493_vm2, %v491_v29, %v496_v37  ;;  %vm539_vm3 = vcmp.ge.f32.partialorder %v537_v26, 0.0 }
 0x111   : > { %v536_v50 = vadd.f32 %v534_v25, %v524_v42  ;;  %v578_v46 = vadd.f32 %v576_v28, %v566_v43  ;;  %v694_v51 = vmul.f32 %v497_v48, %v497_v48  ;;  %v695_v31 = vmul.f32 %v498_v49, %v498_v49 }
 0x112   : > { %v622_v41 = vadd.f32 %v620_v34, %v610_v38  ;;  %v666_v52 = vadd.f32 %v664_v45, %v654_v47  ;;  %v541_v44 = vmul.f32 %v537_v26, %v1231_v55  ;;  %vm581_vm4 = vcmp.ge.f32.partialorder %v579_v27, 0.0 }
 0x113   : > { %v538_v54 = vadd.f32 %v1229_v53, %v536_v50  ;;  %v580_v56 = vadd.f32 %v1229_v53, %v578_v46  ;;  %v696_v57 = vsel %vm681_vm1, %v694_v51, 0.0  ;;  %v699_v58 = vsel %vm681_vm1, %v695_v31, 0.0 }
 0x114   : > { %v624_v59 = vadd.f32 %v1229_v53, %v622_v41  ;;  %v668_v60 = vadd.f32 %v1229_v53, %v666_v52  ;;  %697 = vadd.xlane.f32.xlu1 %v696_v57  ;;  %700 = vadd.xlane.f32.xlu0 %v699_v58  ;;  %v543_v63 = vsel %vm539_vm3, %v537_v26, %v541_v44  ;;  %vm625_vm5 = vcmp.ge.f32.partialorder %v623_v33, 0.0 }
 0x115   : > { %v542_v61 = vmul.f32 %v538_v54, %v1231_v55  ;;  %v584_v62 = vmul.f32 %v580_v56, %v1231_v55  ;;  %v583_v0 = vmul.f32 %v579_v27, %v1231_v55  ;;  %v627_v1 = vmul.f32 %v623_v33, %v1231_v55 }
 0x116   : > { %vm540_vm6 = vcmp.ge.f32.partialorder %v538_v54, 0.0  ;;  %v671_v2 = vmul.f32 %v667_v36, %v1231_v55  ;;  %vm582_vm7 = vcmp.ge.f32.partialorder %v580_v56, 0.0  ;;  %vm669_vm8 = vcmp.ge.f32.partialorder %v667_v36, 0.0 }
 0x117   : > { %v585_v3 = vsel %vm581_vm4, %v579_v27, %v583_v0  ;;  %v544_v4 = vsel %vm540_vm6, %v538_v54, %v542_v61  ;;  %v586_v5 = vsel %vm582_vm7, %v580_v56, %v584_v62  ;;  %vm626_vm9 = vcmp.ge.f32.partialorder %v624_v59, 0.0 }
 0x118   : > { %v587_v53 = vadd.f32 %v585_v3, %v543_v63  ;;  %v672_v6 = vmul.f32 %v668_v60, %v1231_v55  ;;  %v629_v7 = vsel %vm625_vm5, %v623_v33, %v627_v1  ;;  %v588_v8 = vadd.f32 %v586_v5, %v544_v4 }
 0x119   : > { %v628_v9 = vmul.f32 %v624_v59, %v1231_v55  ;;  %vm670_vm10 = vcmp.ge.f32.partialorder %v668_v60, 0.0  ;;  %v673_v11 = vsel %vm669_vm8, %v667_v36, %v671_v2 }
 0x11a   : > { %v631_v10 = vadd.f32 %v629_v7, %v587_v53  ;;  %v674_v15 = vsel %vm670_vm10, %v668_v60, %v672_v6 }
 0x11b   : > { %v630_v12 = vsel %vm626_vm9, %v624_v59, %v628_v9 }
 0x11c   : > { %v675_v13 = vadd.f32 %v673_v11, %v631_v10  ;;  %v632_v14 = vadd.f32 %v630_v12, %v588_v8 }
 0x11e   : > { %v677_v16 = vmul.f32 0.25, %v675_v13  ;;  %v676_v17 = vadd.f32 %v674_v15, %v632_v14 }
 0x120   : > { %v679_v18 = vmul.f32 %v677_v16, %v677_v16  ;;  %v678_v19 = vmul.f32 0.25, %v676_v17 }
 0x122   : > { %v682_v20 = vsel %vm681_vm1, %v679_v18, 0.0  ;;  %v680_v21 = vmul.f32 %v678_v19, %v678_v19 }
 0x123   : > { %683 = vadd.xlane.f32.xlu0 %v682_v20 }
 0x124   : > { %v685_v22 = vsel %vm681_vm1, %v680_v21, 0.0 }
 0x125   : > { %686 = vadd.xlane.f32.xlu1 %v685_v22 }
 0x19d   : > { %v698_v23 = vpop.xlane.xlu1 %697  ;;  %v701_v55 = vpop.xlane.xlu0 %700 }
 0x19e   : > { %v702_v24 = vmax.f32 %v698_v23, 1e-24  ;;  %v703_v25 = vmax.f32 %v701_v55, 1e-24 }
 0x1a0   : > { %982 = vrsqrt.f32 %v702_v24 }
 0x1a1   : > { %984 = vrsqrt.f32 %v703_v25 }
 0x1ac   : > { %v684_v30 = vpop.xlane.xlu0 %683 }
 0x1ad   : > { %v983_v26 = vpop.eup %982  ;;  %v688_v34 = vmax.f32 %v684_v30, 1e-24 }
 0x1ae   : > { %v985_v27 = vpop.eup %984  ;;  %v706_v28 = vmul.f32 %v983_v26, %v497_v48  ;;  %v687_v33 = vpop.xlane.xlu1 %686 }
 0x1af   : > { %v707_v29 = vmul.f32 %v985_v27, %v498_v49  ;;  %v689_v35 = vmax.f32 %v687_v33, 1e-24  ;;  %986 = vrsqrt.f32 %v688_v34 }
 0x1b0   : > { %710 = vrot.lane.b32.xlu0 %v706_v28, %s1064_s7 }
 0x1b1   : > { %712 = vrot.lane.b32.xlu1 %v707_v29, %s1064_s7  ;;  %988 = vrsqrt.f32 %v689_v35 }
 0x1bc   : > { %v987_v32 = vpop.eup %986 }
 0x1bd   : > { %v692_v39 = vmul.f32 %v987_v32, %v677_v16 }
 0x1be   : > { %v989_v37 = vpop.eup %988 }
 0x1bf   : > { %v693_v36 = vmul.f32 %v989_v37, %v678_v19 }
 0x222   : > { %v711_v40 = vpop.permute.xlu0 %710 }
 0x223   : > { %v716_v42 = vsel %vm681_vm1, %v692_v39, %v711_v40  ;;  %v713_v43 = vpop.permute.xlu1 %712 }
 0x224   : > { %718 = vst [vmem:[%s311_s9] sm:$0xff] %v716_v42  ;;  %v717_v45 = vsel %vm681_vm1, %v693_v36, %v713_v43 }
 0x225   : > { %719 = vst [vmem:[%s311_s9 + $0x8] sm:$0xff] %v717_v45 }
 0x226   : > { %1003 = shalt.err (!%p1000_p7)
}
 0x227   : > { %s1004_s24 = scalar_lea.hbm %s1266_s14, 256  ;;  %s1008_s6 = scalar_lea.hbm %s1316_s5, 512 }
 0x228   : > { %p1005_p10 = scmp.ne.s32.totalorder %s1266_s14, %s1004_s24  ;;  %p1009_p13 = scmp.lt.s32.totalorder %s1266_s14, %s1316_s5 }
 0x229   : > { %p1010_p0 = scmp.lt.s32.totalorder %s1008_s6, %s1004_s24 }
 0x22a   : > { %p1006_p11 = pnand %p1005_p10, %p1140_p6 }
 0x22b   : > { %p1011_p1 = por %p1010_p0, %p1009_p13 }
 0x22c   : > { %p1007_p12 = pneg %p1006_p11 }
 0x22e   : > { %p1012_p2 = pnand %p1011_p1, %p1007_p12 }
 0x230   : > { %1015 = shalt.err (!%p1012_p2)
}
 0x231   : > { %s1066_s9 = smov 128   ;;  %s1067_s11 = smov 8  }
 0x232   : > { %897 = dma.vmem_to_hbm [thread:$0]  (%p1140_p6), %s1261_s10, 256, %s1266_s14, %s721_s4, %s1066_s9, %s1066_s9, %s1067_s11  }
 0x233 PF: > { %s749_s12 = sand.u32 1, %s1038_s20   ;;  %p900_p3 = pnand %p816_p9, %p1144_p8 }
 0x234   : > { %s750_s13 = scalar_lea.sflag [#allocation5], %s749_s12 }
 0x235   : > { %p901_p4 = pneg %p900_p3 }
 0x237   : > { %1033 = dma.done.wait (%p901_p4), %s750_s13, 256  }
 0x238   : > { %1035 = vsyncadd (%p901_p4), %s750_s13, 4294967040  ;;  %p16_p5 = scmp.ge.s32.totalorder %s1126_s25, 4   ;;  %s1319_s20 = smov %s1042_s21 }
 0x239   : > { %s1320_s21 = smov %s1046_s22  ;;  %s1321_s22 = smov %s1138_s28 }
 0x23a   : > { %s1322_s23 = smov %s1126_s25  ;;  %18 = sbr.rel (!%p16_p5) target bundleno = 5 (0x5), region = 124 }
 0x23f   :  { %755 = vsyncpa [#allocation5], 1 }
 0x240   :  { %757 = vsyncpa [#allocation5 + $0x1], 1 }

</bundles_post_ra>
